<compile_context>
chip_gen: v5e
topology: v5e:2x2
jax: 0.10.0
libtpu: 0.0.40
codegen_flags: <defaults>
</compile_context>

<pallas_src>
import jax
import jax.numpy as jnp
from jax.experimental import pallas as pl
from jax.experimental.pallas import tpu as pltpu


def _round_up(n, m):
    return ((n + m - 1) // m) * m


def _mlp_kernel(x_ref, w1_ref, b1_ref, w2_ref, b2_ref, o_ref):
    # x:  (tm, Dp) f32    w1: (Dp, Hp) bf16   b1: (1, Hp) f32
    # w2: (Hp, Cp) bf16   b2: (1, Cp)  f32    o:  (tm, Cp) f32
    # Cast x in VMEM (VPU) so the wrapper never writes a bf16 copy of x to HBM.
    x = x_ref[...].astype(w1_ref.dtype)
    # fc1 on the MXU (bf16 operands, f32 accumulation); bias + ReLU in f32 on the VPU.
    h = jnp.dot(x, w1_ref[...], preferred_element_type=jnp.float32) + b1_ref[...]
    h = jnp.maximum(h, 0.0)
    # fc2: cast activations back to the weight dtype for the MXU, accumulate in f32.
    out = jnp.dot(h.astype(w2_ref.dtype), w2_ref[...],
                  preferred_element_type=jnp.float32) + b2_ref[...]
    o_ref[...] = out.astype(o_ref.dtype)


def prepare_params(w1, b1, w2, b2, *, matmul_dtype=jnp.bfloat16):
    """Pad/cast parameters ONCE (call at init time, reuse across forward calls).

    Hidden/class dims are zero-padded to 128-multiples so the kernel is
    lane-dense; zero W1 rows / W2 columns / biases contribute exactly zero
    through ReLU and fc2.
    """
    D, H = w1.shape
    C = w2.shape[1]
    Dp, Hp, Cp = _round_up(D, 128), _round_up(H, 128), _round_up(C, 128)
    w1_p = jnp.zeros((Dp, Hp), matmul_dtype).at[:D, :H].set(w1.astype(matmul_dtype))
    w2_p = jnp.zeros((Hp, Cp), matmul_dtype).at[:H, :C].set(w2.astype(matmul_dtype))
    b1_p = jnp.zeros((1, Hp), jnp.float32).at[0, :H].set(b1.astype(jnp.float32))
    b2_p = jnp.zeros((1, Cp), jnp.float32).at[0, :C].set(b2.astype(jnp.float32))
    return w1_p, b1_p, w2_p, b2_p


def simple_classifier_forward(x_nchw, w1_p, b1_p, w2_p, b2_p, *,
                              num_classes, block_b=512):
    """x_nchw: (B, ...) float32, flattened to (B, input_size).

    Takes the PRE-PADDED params from prepare_params(); returns f32 logits
    (B, num_classes).
    """
    B = x_nchw.shape[0]
    x_flat = x_nchw.reshape(B, -1)                # nn.Flatten(); view-only in XLA
    D = x_flat.shape[1]
    Dp, Hp = w1_p.shape
    Cp = w2_p.shape[1]
    assert D <= Dp, f"input_size {D} exceeds padded weight rows {Dp}"
    if D < Dp:
        # Rare path (input_size not a 128-multiple): pad K columns with zeros,
        # matching the zero rows of w1_p.  No-op for D == Dp (e.g. 1024).
        x_flat = jnp.pad(x_flat, ((0, 0), (0, Dp - D)))

    # Batch tile: multiple of 16 (bf16 sublane packing), up to block_b.
    tm = min(block_b, _round_up(B, 16))
    # v7x has 2 TensorCores; when the batch allows, ensure >=2 grid steps so
    # the "parallel" axis lands work on both cores (neutral on v5e/v6e).
    if B > 16:
        tm = min(tm, _round_up((B + 1) // 2, 16))
    num_blocks = (B + tm - 1) // tm
    Bt = num_blocks * tm                          # grid-covered rows (>= B)

    cost = pl.CostEstimate(
        flops=2 * Bt * Dp * Hp + 2 * Bt * Hp * Cp,
        transcendentals=0,
        bytes_accessed=(B * Dp * 4                      # x (f32, read once)
                        + (Dp * Hp + Hp * Cp) * 2       # bf16 weights
                        + (Hp + Cp) * 4                 # f32 biases
                        + Bt * Cp * 4),                 # f32 padded logits
    )

    # TODO(synk): if input_size grows so the (Dp, Hp) weight block no longer
    # fits scoped VMEM (design against v7x: 64 MiB physical / 32 MiB scoped
    # default), add a K-reduction grid axis ("arbitrary", last) with a VMEM
    # accumulator + pl.when init/finalize, single-buffer the resident weight
    # specs (pipeline_mode=pl.Buffered(1)) and raise vmem_limit_bytes.
    out_padded = pl.pallas_call(
        _mlp_kernel,
        out_shape=jax.ShapeDtypeStruct((Bt, Cp), jnp.float32),
        grid=(num_blocks,),
        in_specs=[
            pl.BlockSpec((tm, Dp), lambda i: (i, 0)),   # activations: tiled over batch
            pl.BlockSpec((Dp, Hp), lambda i: (0, 0)),   # weights stay VMEM-resident
            pl.BlockSpec((1, Hp), lambda i: (0, 0)),
            pl.BlockSpec((Hp, Cp), lambda i: (0, 0)),
            pl.BlockSpec((1, Cp), lambda i: (0, 0)),
        ],
        out_specs=pl.BlockSpec((tm, Cp), lambda i: (i, 0)),
        compiler_params=pltpu.CompilerParams(
            dimension_semantics=("parallel",),          # v7x: shard batch over 2 TCs
        ),
        cost_estimate=cost,
    )(x_flat, w1_p, b1_p, w2_p, b2_p)

    return out_padded[:B, :num_classes]


def init_params(key, input_size, hidden_size, num_classes):
    # Deterministic init mimicking nn.Linear's uniform(-1/sqrt(fan_in), 1/sqrt(fan_in)).
    k1, k2, k3, k4 = jax.random.split(key, 4)
    bound1 = 1.0 / jnp.sqrt(input_size)
    bound2 = 1.0 / jnp.sqrt(hidden_size)
    # Stored as (in_features, out_features) -- transpose of PyTorch's layout.
    w1 = jax.random.uniform(k1, (input_size, hidden_size), jnp.float32, -bound1, bound1)
    b1 = jax.random.uniform(k2, (hidden_size,), jnp.float32, -bound1, bound1)
    w2 = jax.random.uniform(k3, (hidden_size, num_classes), jnp.float32, -bound2, bound2)
    b2 = jax.random.uniform(k4, (num_classes,), jnp.float32, -bound2, bound2)
    return w1, b1, w2, b2


if __name__ == "__main__":
    key = jax.random.PRNGKey(0)
    kx, kp = jax.random.split(key)

    # Small shapes consistent with the module: x (B, C, H, W), flattened to input_size.
    B, Cin, Himg, Wimg = 2, 4, 16, 16
    input_size = Cin * Himg * Wimg          # 1024
    hidden_size = 32
    num_classes = 8

    x = jax.random.normal(kx, (B, Cin, Himg, Wimg), jnp.float32)
    w1, b1, w2, b2 = init_params(kp, input_size, hidden_size, num_classes)

    # Pad/cast the weights ONCE; reuse across every forward call.
    padded_params = jax.block_until_ready(prepare_params(w1, b1, w2, b2))

    fwd = jax.jit(simple_classifier_forward,
                  static_argnames=("num_classes", "block_b"))
    out = fwd(x, *padded_params, num_classes=num_classes)
    out = jax.block_until_ready(out)
    assert out.shape == (B, num_classes)

    # Reference 1: same bf16 operand rounding as the kernel (tight tolerance).
    x_flat = x.reshape(B, -1)
    xb = x_flat.astype(jnp.bfloat16)
    w1b = w1.astype(jnp.bfloat16)
    w2b = w2.astype(jnp.bfloat16)
    h_ref = jnp.maximum(
        jnp.dot(xb, w1b, preferred_element_type=jnp.float32) + b1, 0.0)
    ref_bf16 = jnp.dot(h_ref.astype(jnp.bfloat16), w2b,
                       preferred_element_type=jnp.float32) + b2
    assert jnp.allclose(out, ref_bf16, atol=1e-3, rtol=1e-3), (
        jnp.max(jnp.abs(out - ref_bf16)))

    # Reference 2: original module's pure-f32 math (looser tolerance, bf16 operands).
    ref_f32 = jnp.maximum(x_flat @ w1 + b1, 0.0) @ w2 + b2
    assert jnp.allclose(out, ref_f32, atol=5e-2, rtol=5e-2), (
        jnp.max(jnp.abs(out - ref_f32)))

    print("KERNEL_OK")
</pallas_src>

<mosaic_0001>
module attributes {stable_mosaic.version = 11 : i64} {
  func.func @_mlp_kernel(%arg0: i32, %arg1: memref<16x1024xf32, #tpu.memory_space<vmem>>, %arg2: memref<1024x128xbf16, #tpu.memory_space<vmem>>, %arg3: memref<1x128xf32, #tpu.memory_space<vmem>>, %arg4: memref<128x128xbf16, #tpu.memory_space<vmem>>, %arg5: memref<1x128xf32, #tpu.memory_space<vmem>>, %arg6: memref<16x128xf32, #tpu.memory_space<vmem>>) attributes {dimension_semantics = [#tpu.dimension_semantics<parallel>], iteration_bounds = array<i64: 1>, scalar_prefetch = 0 : i64, scratch_operands = 0 : i64, tpu.core_type = #tpu.core_type<tc>, window_params = [{transform_indices = @transform_0, window_bounds = array<i64: 16, 1024>}, {pipeline_mode = #tpu.pipeline_mode<synchronous>, transform_indices = @transform_1, window_bounds = array<i64: 1024, 128>}, {pipeline_mode = #tpu.pipeline_mode<synchronous>, transform_indices = @transform_2, window_bounds = array<i64: 1, 128>}, {pipeline_mode = #tpu.pipeline_mode<synchronous>, transform_indices = @transform_3, window_bounds = array<i64: 128, 128>}, {pipeline_mode = #tpu.pipeline_mode<synchronous>, transform_indices = @transform_4, window_bounds = array<i64: 1, 128>}, {transform_indices = @transform_5, window_bounds = array<i64: 16, 128>}]} {
    %c0 = arith.constant 0 : index
    %c0_0 = arith.constant 0 : index
    %0 = vector.load %arg1[%c0, %c0_0] : memref<16x1024xf32, #tpu.memory_space<vmem>>, vector<16x1024xf32>
    %1 = arith.truncf %0 : vector<16x1024xf32> to vector<16x1024xbf16>
    %c0_1 = arith.constant 0 : index
    %c0_2 = arith.constant 0 : index
    %2 = vector.load %arg2[%c0_1, %c0_2] : memref<1024x128xbf16, #tpu.memory_space<vmem>>, vector<1024x128xbf16>
    %cst = arith.constant dense<0.000000e+00> : vector<16x128xf32>
    %3 = tpu.matmul %1, %2, %cst {dimension_numbers = #tpu.dot_dimension_numbers<[1], [0], [0], [1], [0, 0, 1, 1], [], []>} : vector<16x1024xbf16>, vector<1024x128xbf16>, vector<16x128xf32> -> vector<16x128xf32>
    %c0_3 = arith.constant 0 : index
    %c0_4 = arith.constant 0 : index
    %4 = vector.load %arg3[%c0_3, %c0_4] : memref<1x128xf32, #tpu.memory_space<vmem>>, vector<1x128xf32>
    %5 = vector.broadcast %4 : vector<1x128xf32> to vector<16x128xf32>
    %6 = arith.addf %3, %5 : vector<16x128xf32>
    %cst_5 = arith.constant 0.000000e+00 : f32
    %7 = vector.broadcast %cst_5 : f32 to vector<16x128xf32>
    %8 = arith.maximumf %6, %7 : vector<16x128xf32>
    %9 = arith.truncf %8 : vector<16x128xf32> to vector<16x128xbf16>
    %c0_6 = arith.constant 0 : index
    %c0_7 = arith.constant 0 : index
    %10 = vector.load %arg4[%c0_6, %c0_7] : memref<128x128xbf16, #tpu.memory_space<vmem>>, vector<128x128xbf16>
    %cst_8 = arith.constant dense<0.000000e+00> : vector<16x128xf32>
    %11 = tpu.matmul %9, %10, %cst_8 {dimension_numbers = #tpu.dot_dimension_numbers<[1], [0], [0], [1], [0, 0, 1, 1], [], []>} : vector<16x128xbf16>, vector<128x128xbf16>, vector<16x128xf32> -> vector<16x128xf32>
    %c0_9 = arith.constant 0 : index
    %c0_10 = arith.constant 0 : index
    %12 = vector.load %arg5[%c0_9, %c0_10] : memref<1x128xf32, #tpu.memory_space<vmem>>, vector<1x128xf32>
    %13 = vector.broadcast %12 : vector<1x128xf32> to vector<16x128xf32>
    %14 = arith.addf %11, %13 : vector<16x128xf32>
    %c0_11 = arith.constant 0 : index
    %c0_12 = arith.constant 0 : index
    %15 = vector.load %arg6[%c0_11, %c0_12] : memref<16x128xf32, #tpu.memory_space<vmem>>, vector<16x128xf32>
    tpu.vector_store %arg6[%c0_11, %c0_12], %14 {strides = array<i32>} : memref<16x128xf32, #tpu.memory_space<vmem>>, vector<16x128xf32>,
    return
  }
  func.func @transform_0(%arg0: i32) -> (i32, i32) {
    %c0_i32 = arith.constant 0 : i32
    %c0_i32_0 = arith.constant 0 : i32
    return %arg0, %c0_i32 : i32, i32
  }
  func.func @transform_1(%arg0: i32) -> (i32, i32) {
    %c0_i32 = arith.constant 0 : i32
    %c0_i32_0 = arith.constant 0 : i32
    %c0_i32_1 = arith.constant 0 : i32
    return %c0_i32, %c0_i32_0 : i32, i32
  }
  func.func @transform_2(%arg0: i32) -> (i32, i32) {
    %c0_i32 = arith.constant 0 : i32
    %c0_i32_0 = arith.constant 0 : i32
    %c0_i32_1 = arith.constant 0 : i32
    return %c0_i32, %c0_i32_0 : i32, i32
  }
  func.func @transform_3(%arg0: i32) -> (i32, i32) {
    %c0_i32 = arith.constant 0 : i32
    %c0_i32_0 = arith.constant 0 : i32
    %c0_i32_1 = arith.constant 0 : i32
    return %c0_i32, %c0_i32_0 : i32, i32
  }
  func.func @transform_4(%arg0: i32) -> (i32, i32) {
    %c0_i32 = arith.constant 0 : i32
    %c0_i32_0 = arith.constant 0 : i32
    %c0_i32_1 = arith.constant 0 : i32
    return %c0_i32, %c0_i32_0 : i32, i32
  }
  func.func @transform_5(%arg0: i32) -> (i32, i32) {
    %c0_i32 = arith.constant 0 : i32
    %c0_i32_0 = arith.constant 0 : i32
    return %arg0, %c0_i32 : i32, i32
  }
}

</mosaic_0001>

<bundles_post_ra>
// kernel: simple_classifier_forward.1
= control target key start
LH: loop header
LB: loop body
LE: loop exit
PB: predicated region body
PF: predicated region fallthrough
CT: control target
= control target key end

     0   :  { %10 = vsyncpa [#allocation3], 0  ;;  %s1242_s21 = smov [#allocation2]   ;;  %s1243_s23 = smov 64   ;;  %s1380_s0 = inlined_call_operand.vmem [shape: f32[2,1024], index: 0, kind: input, shape index: {}]   ;;  %s1381_s1 = inlined_call_operand.hbm [shape: bf16[1024,128], index: 1, kind: input, shape index: {}]   ;;  %s1382_s2 = inlined_call_operand.vmem [shape: f32[1,128], index: 2, kind: input, shape index: {}]   ;;  %s1383_s3 = inlined_call_operand.vmem [shape: bf16[128,128], index: 3, kind: input, shape index: {}]   ;;  %s1384_s4 = inlined_call_operand.vmem [shape: f32[1,128], index: 4, kind: input, shape index: {}]   ;;  %s1385_s5 = inlined_call_operand.vmem [shape: f32[16,128], index: 5, kind: output, shape index: {}]  }
   0x1   :  { %s17_s20 = sshll.u32 %s1381_s1, 4  ;;  %s19_s22 = sshll.u32 %s1242_s21, 4  ;;  %s18_s20 = int_to_ptr.hbm [resolvable:$true] %s17_s20  ;;  %s20_s22 = int_to_ptr.vmem [resolvable:$true] %s19_s22 }
   0x2   :  { %s1244_s24 = smov 4  }
   0x3   :  { %25 = dma.hbm_to_vmem [thread:$0]  %s18_s20, 8192, %s20_s22, [#allocation3], %s1243_s23, %s1243_s23, %s1244_s24  }
   0x4   :  { %1240 = dma.done.wait [#allocation3], 8192  }
   0x5   :  { %1241 = vsyncadd [#allocation3], 4294959104  ;;  %v1146_v0 = vld [vmem:[#allocation2 + $0x38] sm:$0xff]  ;;  %v1145_v4 = vld [vmem:[#allocation2 + $0x30] sm:$0xff] }
   0x6   :  { %v1154_v1 = vld [vmem:[#allocation2 + $0x78] sm:$0xff]  ;;  %647 = vmatpush.bf16.msra.mxu0 %v1146_v0  ;;  %v1153_v5 = vld [vmem:[#allocation2 + $0x70] sm:$0xff]  ;;  %v1144_v8 = vld [vmem:[#allocation2 + $0x28] sm:$0xff] }
   0x7   :  { %v1162_v2 = vld [vmem:[#allocation2 + $0xb8] sm:$0xff]  ;;  %661 = vmatpush.bf16.msra.mxu1 %v1154_v1  ;;  %v1161_v6 = vld [vmem:[#allocation2 + $0xb0] sm:$0xff]  ;;  %v1152_v9 = vld [vmem:[#allocation2 + $0x68] sm:$0xff] }
   0x8   :  { %v1170_v3 = vld [vmem:[#allocation2 + $0xf8] sm:$0xff]  ;;  %675 = vmatpush.bf16.msra.mxu2 %v1162_v2  ;;  %v1169_v7 = vld [vmem:[#allocation2 + $0xf0] sm:$0xff]  ;;  %v1160_v10 = vld [vmem:[#allocation2 + $0xa8] sm:$0xff] }
   0x9   :  { %689 = vmatpush.bf16.msra.mxu3 %v1170_v3  ;;  %v1168_v11 = vld [vmem:[#allocation2 + $0xe8] sm:$0xff]  ;;  %v1143_v12 = vld [vmem:[#allocation2 + $0x20] sm:$0xff]  ;;  %v1142_v16 = vld [vmem:[#allocation2 + $0x18] sm:$0xff] }
   0xa   :  { %648 = vmatpush.bf16.msra.mxu0 %v1145_v4  ;;  %v1151_v13 = vld [vmem:[#allocation2 + $0x60] sm:$0xff]  ;;  %v36_v17 = vld [vmem:[%s1380_s0] sm:$0xff]  ;;  %v38_v18 = vld [vmem:[%s1380_s0 + $0x10] sm:$0xff] }
   0xb   :  { %662 = vmatpush.bf16.msra.mxu1 %v1153_v5  ;;  %v1159_v14 = vld [vmem:[#allocation2 + $0xa0] sm:$0xff]  ;;  %v1150_v19 = vld [vmem:[#allocation2 + $0x58] sm:$0xff]  ;;  %v42_v21 = vld [vmem:[%s1380_s0 + $0x30] sm:$0xff]  ;;  %68 = vst [vmem:[#allocation1] ss:$4 sm:$0xff] %v36_v17 }
   0xc   :  { %676 = vmatpush.bf16.msra.mxu2 %v1161_v6  ;;  %v1167_v15 = vld [vmem:[#allocation2 + $0xe0] sm:$0xff]  ;;  %v40_v20 = vld [vmem:[%s1380_s0 + $0x20] sm:$0xff]  ;;  %70 = vst [vmem:[#allocation1 + $0x1] ss:$4 sm:$0xff] %v38_v18  ;;  %v1141_v24 = vld [vmem:[#allocation2 + $0x10] sm:$0xff] }
   0xd   :  { %690 = vmatpush.bf16.msra.mxu3 %v1169_v7  ;;  %v1158_v22 = vld [vmem:[#allocation2 + $0x98] sm:$0xff]  ;;  %72 = vst [vmem:[#allocation1 + $0x2] ss:$4 sm:$0xff] %v40_v20  ;;  %v1149_v25 = vld [vmem:[#allocation2 + $0x50] sm:$0xff]  ;;  %v1140_v28 = vld [vmem:[#allocation2 + $0x8] sm:$0xff] }
   0xe   :  { %649 = vmatpush.bf16.msra.mxu0 %v1144_v8  ;;  %v1166_v23 = vld [vmem:[#allocation2 + $0xd8] sm:$0xff]  ;;  %74 = vst [vmem:[#allocation1 + $0x3] ss:$4 sm:$0xff] %v42_v21  ;;  %v1157_v26 = vld [vmem:[#allocation2 + $0x90] sm:$0xff]  ;;  %v1148_v29 = vld [vmem:[#allocation2 + $0x48] sm:$0xff] }
   0xf   :  { %663 = vmatpush.bf16.msra.mxu1 %v1152_v9  ;;  %v1165_v27 = vld [vmem:[#allocation2 + $0xd0] sm:$0xff]  ;;  %v37_v30 = vld [vmem:[%s1380_s0 + $0x8] sm:$0xff]  ;;  %v1156_v31 = vld [vmem:[#allocation2 + $0x88] sm:$0xff] }
  0x10   :  { %677 = vmatpush.bf16.msra.mxu2 %v1160_v10  ;;  %v1164_v32 = vld [vmem:[#allocation2 + $0xc8] sm:$0xff]  ;;  %v39_v33 = vld [vmem:[%s1380_s0 + $0x18] sm:$0xff]  ;;  %76 = vst [vmem:[#allocation1 + $0x20] ss:$4 sm:$0xff] %v37_v30  ;;  %v44_v34 = vld [vmem:[%s1380_s0 + $0x40] sm:$0xff] }
  0x11   :  { %691 = vmatpush.bf16.msra.mxu3 %v1168_v11  ;;  %v46_v35 = vld [vmem:[%s1380_s0 + $0x50] sm:$0xff]  ;;  %v48_v36 = vld [vmem:[%s1380_s0 + $0x60] sm:$0xff]  ;;  %78 = vst [vmem:[#allocation1 + $0x21] ss:$4 sm:$0xff] %v39_v33  ;;  %v1139_v37 = vld [vmem:[#allocation2] sm:$0xff] }
  0x12   :  { %650 = vmatpush.bf16.msra.mxu0 %v1143_v12  ;;  %v1147_v42 = vld [vmem:[#allocation2 + $0x40] sm:$0xff]  ;;  %v50_v44 = vld [vmem:[%s1380_s0 + $0x70] sm:$0xff]  ;;  %v1178_v46 = vld [vmem:[#allocation2 + $0x138] sm:$0xff] }
  0x13   :  { %664 = vmatpush.bf16.msra.mxu1 %v1151_v13  ;;  %v1155_v43 = vld [vmem:[#allocation2 + $0x80] sm:$0xff]  ;;  %v1186_v48 = vld [vmem:[#allocation2 + $0x178] sm:$0xff]  ;;  %v43_v49 = vld [vmem:[%s1380_s0 + $0x38] sm:$0xff] }
  0x14   :  { %678 = vmatpush.bf16.msra.mxu2 %v1159_v14  ;;  %v1163_v45 = vld [vmem:[#allocation2 + $0xc0] sm:$0xff]  ;;  %v1194_v50 = vld [vmem:[#allocation2 + $0x1b8] sm:$0xff]  ;;  %82 = vst [vmem:[#allocation1 + $0x23] ss:$4 sm:$0xff] %v43_v49  ;;  %v1177_v52 = vld [vmem:[#allocation2 + $0x130] sm:$0xff] }
  0x15   :  { %692 = vmatpush.bf16.msra.mxu3 %v1167_v15  ;;  %v83_v38 = vld.sshfl [vmem:[#allocation1] sm:$0xff pattern:$0x73625140]  ;;  %v1305_v39 = vld.sshfl [vmem:[#allocation1 + $0x8] sm:$0xff pattern:$0x73625140] }
  0x16   :  { %651 = vmatpush.bf16.msra.mxu0 %v1142_v16  ;;  %v85_v40 = vld.sshfl [vmem:[#allocation1 + $0x10] sm:$0xff pattern:$0x73625140]  ;;  %v1307_v41 = vld.sshfl [vmem:[#allocation1 + $0x18] sm:$0xff pattern:$0x73625140] }
  0x17   :  { %665 = vmatpush.bf16.msra.mxu1 %v1150_v19  ;;  %91 = vst [vmem:[#allocation1] ss:$4 sm:$0xff] %v44_v34  ;;  %v41_v47 = vld [vmem:[%s1380_s0 + $0x28] sm:$0xff]  ;;  %v1202_v51 = vld [vmem:[#allocation2 + $0x1f8] sm:$0xff]  ;;  %v1185_v53 = vld [vmem:[#allocation2 + $0x170] sm:$0xff] }
  0x18   :  { %679 = vmatpush.bf16.msra.mxu2 %v1158_v22  ;;  %92 = vst [vmem:[#allocation1 + $0x1] ss:$4 sm:$0xff] %v46_v35  ;;  %v1193_v54 = vld [vmem:[#allocation2 + $0x1b0] sm:$0xff]  ;;  %v1176_v56 = vld [vmem:[#allocation2 + $0x128] sm:$0xff]  ;;  %v45_v60 = vld [vmem:[%s1380_s0 + $0x48] sm:$0xff] }
  0x19   :  { %693 = vmatpush.bf16.msra.mxu3 %v1166_v23  ;;  %93 = vst [vmem:[#allocation1 + $0x2] ss:$4 sm:$0xff] %v48_v36  ;;  %v1201_v55 = vld [vmem:[#allocation2 + $0x1f0] sm:$0xff]  ;;  %v1184_v57 = vld [vmem:[#allocation2 + $0x168] sm:$0xff]  ;;  %v49_v4 = vld [vmem:[%s1380_s0 + $0x68] sm:$0xff] }
  0x1a   :  { %652 = vmatpush.bf16.msra.mxu0 %v1141_v24  ;;  %94 = vst [vmem:[#allocation1 + $0x3] ss:$4 sm:$0xff] %v50_v44  ;;  %v1192_v58 = vld [vmem:[#allocation2 + $0x1a8] sm:$0xff]  ;;  %v47_v63 = vld [vmem:[%s1380_s0 + $0x58] sm:$0xff]  ;;  %v1175_v11 = vld [vmem:[#allocation2 + $0x120] sm:$0xff] }
  0x1b   :  { %666 = vmatpush.bf16.msra.mxu1 %v1149_v25  ;;  %80 = vst [vmem:[#allocation1 + $0x22] ss:$4 sm:$0xff] %v41_v47  ;;  %v1200_v59 = vld [vmem:[#allocation2 + $0x1e8] sm:$0xff]  ;;  %v1183_v12 = vld [vmem:[#allocation2 + $0x160] sm:$0xff]  ;;  %v51_v13 = vld [vmem:[%s1380_s0 + $0x78] sm:$0xff] }
  0x1c   :  { %680 = vmatpush.bf16.msra.mxu2 %v1157_v26  ;;  %v1191_v14 = vld [vmem:[#allocation2 + $0x1a0] sm:$0xff]  ;;  %v1174_v16 = vld [vmem:[#allocation2 + $0x118] sm:$0xff]  ;;  %v1173_v20 = vld [vmem:[#allocation2 + $0x110] sm:$0xff] }
  0x1d   :  { %694 = vmatpush.bf16.msra.mxu3 %v1165_v27  ;;  %v1199_v15 = vld [vmem:[#allocation2 + $0x1e0] sm:$0xff]  ;;  %v1182_v17 = vld [vmem:[#allocation2 + $0x158] sm:$0xff]  ;;  %v1181_v21 = vld [vmem:[#allocation2 + $0x150] sm:$0xff] }
  0x1e   :  { %653 = vmatpush.bf16.msra.mxu0 %v1140_v28  ;;  %v1190_v18 = vld [vmem:[#allocation2 + $0x198] sm:$0xff]  ;;  %v1189_v22 = vld [vmem:[#allocation2 + $0x190] sm:$0xff]  ;;  %v1172_v24 = vld [vmem:[#allocation2 + $0x108] sm:$0xff] }
  0x1f   :  { %667 = vmatpush.bf16.msra.mxu1 %v1148_v29  ;;  %v1198_v19 = vld [vmem:[#allocation2 + $0x1d8] sm:$0xff]  ;;  %v1197_v23 = vld [vmem:[#allocation2 + $0x1d0] sm:$0xff]  ;;  %v1180_v25 = vld [vmem:[#allocation2 + $0x148] sm:$0xff] }
  0x20   :  { %681 = vmatpush.bf16.msra.mxu2 %v1156_v31  ;;  %v1188_v26 = vld [vmem:[#allocation2 + $0x188] sm:$0xff]  ;;  %v1171_v28 = vld [vmem:[#allocation2 + $0x100] sm:$0xff]  ;;  %v1206_v44 = vld [vmem:[%s1383_s3 + $0x18] sm:$0xff] }
  0x21   :  { %695 = vmatpush.bf16.msra.mxu3 %v1164_v32  ;;  %v101_v61 = vld.sshfl [vmem:[#allocation1 + $0x10] sm:$0xff pattern:$0x73625140]  ;;  %v99_v62 = vld.sshfl [vmem:[#allocation1] sm:$0xff pattern:$0x73625140] }
  0x22   :  { %654 = vmatpush.bf16.msra.mxu0 %v1139_v37  ;;  %v125_v0 = vpack.c.bf16 %v101_v61, %v85_v40  ;;  %v123_v1 = vpack.c.bf16 %v99_v62, %v83_v38  ;;  %v102_v2 = vld.sshfl [vmem:[#allocation1 + $0x18] sm:$0xff pattern:$0x73625140]  ;;  %v100_v3 = vld.sshfl [vmem:[#allocation1 + $0x8] sm:$0xff pattern:$0x73625140] }
  0x23   :  { %668 = vmatpush.bf16.msra.mxu1 %v1147_v42  ;;  %v126_v5 = vpack.c.bf16 %v102_v2, %v1307_v41  ;;  %v124_v6 = vpack.c.bf16 %v100_v3, %v1305_v39  ;;  %v1329_v7 = vld.sshfl [vmem:[#allocation1 + $0x20] sm:$0xff pattern:$0x73625140]  ;;  %v1331_v8 = vld.sshfl [vmem:[#allocation1 + $0x28] sm:$0xff pattern:$0x73625140] }
  0x24   :  { %682 = vmatpush.bf16.msra.mxu2 %v1155_v43  ;;  %v1333_v9 = vld.sshfl [vmem:[#allocation1 + $0x30] sm:$0xff pattern:$0x73625140]  ;;  %v1335_v10 = vld.sshfl [vmem:[#allocation1 + $0x38] sm:$0xff pattern:$0x73625140] }
  0x25   :  { %696 = vmatpush.bf16.msra.mxu3 %v1163_v45  ;;  %655 = vmatmul.bf16.vlgmr.msra.gmra.mxu0 %v123_v1  ;;  %95 = vst [vmem:[#allocation1 + $0x20] ss:$4 sm:$0xff] %v45_v60  ;;  %v1196_v27 = vld [vmem:[#allocation2 + $0x1c8] sm:$0xff]  ;;  %v1179_v29 = vld [vmem:[#allocation2 + $0x140] sm:$0xff]  ;;  %v1210_v40 = vld [vmem:[%s1383_s3 + $0x38] sm:$0xff] }
  0x26   :  { %703 = vmatpush.bf16.msrb.mxu0 %v1178_v46  ;;  %96 = vst [vmem:[#allocation1 + $0x21] ss:$4 sm:$0xff] %v47_v63  ;;  %669 = vmatmul.bf16.vlgmr.msra.gmra.mxu1 %v124_v6  ;;  %v1187_v30 = vld [vmem:[#allocation2 + $0x180] sm:$0xff]  ;;  %v1209_v41 = vld [vmem:[%s1383_s3 + $0x30] sm:$0xff]  ;;  %v1207_v43 = vld [vmem:[%s1383_s3 + $0x20] sm:$0xff] }
  0x27   :  { %717 = vmatpush.bf16.msrb.mxu1 %v1186_v48  ;;  %683 = vmatmul.bf16.vlgmr.msra.gmra.mxu2 %v125_v0  ;;  %97 = vst [vmem:[#allocation1 + $0x22] ss:$4 sm:$0xff] %v49_v4  ;;  %v1195_v31 = vld [vmem:[#allocation2 + $0x1c0] sm:$0xff]  ;;  %v1205_v45 = vld [vmem:[%s1383_s3 + $0x10] sm:$0xff]  ;;  %v1203_v49 = vld [vmem:[%s1383_s3] sm:$0xff] }
  0x28   :  { %731 = vmatpush.bf16.msrb.mxu2 %v1194_v50  ;;  %697 = vmatmul.bf16.vlgmr.msra.gmra.mxu3 %v126_v5  ;;  %98 = vst [vmem:[#allocation1 + $0x23] ss:$4 sm:$0xff] %v51_v13  ;;  %v1208_v42 = vld [vmem:[%s1383_s3 + $0x28] sm:$0xff]  ;;  %v1214_v50 = vld [vmem:[%s1382_s2] ss:$0 sm:$0xff] }
  0x29   :  { %745 = vmatpush.bf16.msrb.mxu3 %v1202_v51  ;;  %v1204_v47 = vld [vmem:[%s1383_s3 + $0x8] sm:$0xff] }
  0x2a   :  { %704 = vmatpush.bf16.msrb.mxu0 %v1177_v52 }
  0x2b   :  { %718 = vmatpush.bf16.msrb.mxu1 %v1185_v53 }
  0x2c   :  { %732 = vmatpush.bf16.msrb.mxu2 %v1193_v54 }
  0x2d   :  { %746 = vmatpush.bf16.msrb.mxu3 %v1201_v55 }
  0x2e   :  { %705 = vmatpush.bf16.msrb.mxu0 %v1176_v56 }
  0x2f   :  { %719 = vmatpush.bf16.msrb.mxu1 %v1184_v57  ;;  %v103_v32 = vld.sshfl [vmem:[#allocation1 + $0x20] sm:$0xff pattern:$0x73625140]  ;;  %v104_v33 = vld.sshfl [vmem:[#allocation1 + $0x28] sm:$0xff pattern:$0x73625140] }
  0x30   :  { %733 = vmatpush.bf16.msrb.mxu2 %v1192_v58  ;;  %v105_v34 = vld.sshfl [vmem:[#allocation1 + $0x30] sm:$0xff pattern:$0x73625140]  ;;  %v106_v35 = vld.sshfl [vmem:[#allocation1 + $0x38] sm:$0xff pattern:$0x73625140]  ;;  %v127_v36 = vpack.c.bf16 %v103_v32, %v1329_v7  ;;  %v128_v37 = vpack.c.bf16 %v104_v33, %v1331_v8 }
  0x31   :  { %747 = vmatpush.bf16.msrb.mxu3 %v1200_v59  ;;  %v129_v38 = vpack.c.bf16 %v105_v34, %v1333_v9  ;;  %v130_v39 = vpack.c.bf16 %v106_v35, %v1335_v10 }
  0x32   :  { %706 = vmatpush.bf16.msrb.mxu0 %v1175_v11 }
  0x33   :  { %720 = vmatpush.bf16.msrb.mxu1 %v1183_v12 }
  0x34   :  { %734 = vmatpush.bf16.msrb.mxu2 %v1191_v14 }
  0x35   :  { %748 = vmatpush.bf16.msrb.mxu3 %v1199_v15 }
  0x36   :  { %707 = vmatpush.bf16.msrb.mxu0 %v1174_v16 }
  0x37   :  { %721 = vmatpush.bf16.msrb.mxu1 %v1182_v17 }
  0x38   :  { %735 = vmatpush.bf16.msrb.mxu2 %v1190_v18 }
  0x39   :  { %749 = vmatpush.bf16.msrb.mxu3 %v1198_v19 }
  0x3a   :  { %708 = vmatpush.bf16.msrb.mxu0 %v1173_v20  ;;  %v1215_v20 = vld [vmem:[%s1384_s4] ss:$0 sm:$0xff] }
  0x3b   :  { %722 = vmatpush.bf16.msrb.mxu1 %v1181_v21 }
  0x3c   :  { %736 = vmatpush.bf16.msrb.mxu2 %v1189_v22 }
  0x3d   :  { %750 = vmatpush.bf16.msrb.mxu3 %v1197_v23 }
  0x3e   :  { %709 = vmatpush.bf16.msrb.mxu0 %v1172_v24 }
  0x3f   :  { %723 = vmatpush.bf16.msrb.mxu1 %v1180_v25 }
  0x40   :  { %737 = vmatpush.bf16.msrb.mxu2 %v1188_v26 }
  0x41   :  { %751 = vmatpush.bf16.msrb.mxu3 %v1196_v27 }
  0x42   :  { %710 = vmatpush.bf16.msrb.mxu0 %v1171_v28 }
  0x43   :  { %724 = vmatpush.bf16.msrb.mxu1 %v1179_v29 }
  0x44   :  { %738 = vmatpush.bf16.msrb.mxu2 %v1187_v30 }
  0x45   :  { %752 = vmatpush.bf16.msrb.mxu3 %v1195_v31  ;;  %711 = vmatmul.bf16.vlgmr.msrb.gmra.mxu0 %v127_v36 }
  0x46   :  { %725 = vmatmul.bf16.vlgmr.msrb.gmra.mxu1 %v128_v37  ;;  %830 = vmatpush.bf16.msra.mxu0 %v1210_v40 }
  0x47   :  { %739 = vmatmul.bf16.vlgmr.msrb.gmra.mxu2 %v129_v38 }
  0x48   :  { %753 = vmatmul.bf16.vlgmr.msrb.gmra.mxu3 %v130_v39 }
  0x4a   :  { %831 = vmatpush.bf16.msra.mxu0 %v1209_v41 }
  0x4e   :  { %832 = vmatpush.bf16.msra.mxu0 %v1208_v42 }
  0x52   :  { %833 = vmatpush.bf16.msra.mxu0 %v1207_v43 }
  0x56   :  { %834 = vmatpush.bf16.msra.mxu0 %v1206_v44 }
  0x5a   :  { %835 = vmatpush.bf16.msra.mxu0 %v1205_v45 }
  0x5e   :  { %836 = vmatpush.bf16.msra.mxu0 %v1204_v47 }
  0x62   :  { %837 = vmatpush.bf16.msra.mxu0 %v1203_v49 }
  0xa2   :  { %v656_v46 = vpop.f32.mrf.mxu0 }
  0xa3   :  { %v670_v48 = vpop.f32.mrf.mxu1  ;;  %v657_v53 = vadd.f32 %v1214_v50, %v656_v46 }
  0xa5   :  { %v671_v56 = vadd.f32 %v670_v48, %v657_v53 }
  0xaa   :  { %v684_v51 = vpop.f32.mrf.mxu2  ;;  %v658_v54 = vpop.f32.mrf.mxu0 }
  0xab   :  { %v698_v52 = vpop.f32.mrf.mxu3  ;;  %v672_v55 = vpop.f32.mrf.mxu1  ;;  %v659_v57 = vadd.f32 %v1214_v50, %v658_v54  ;;  %v685_v60 = vadd.f32 %v684_v51, %v671_v56 }
  0xad   :  { %v673_v61 = vadd.f32 %v672_v55, %v659_v57  ;;  %v699_v0 = vadd.f32 %v698_v52, %v685_v60 }
  0xb2   :  { %v686_v58 = vpop.f32.mrf.mxu2 }
  0xb3   :  { %v700_v59 = vpop.f32.mrf.mxu3  ;;  %v687_v1 = vadd.f32 %v686_v58, %v673_v61 }
  0xb5   :  { %v701_v5 = vadd.f32 %v700_v59, %v687_v1 }
  0xc2   :  { %v712_v62 = vpop.f32.mrf.mxu0 }
  0xc3   :  { %v726_v63 = vpop.f32.mrf.mxu1  ;;  %v713_v2 = vadd.f32 %v712_v62, %v699_v0 }
  0xc5   :  { %v727_v7 = vadd.f32 %v726_v63, %v713_v2 }
  0xca   :  { %v740_v3 = vpop.f32.mrf.mxu2  ;;  %v714_v6 = vpop.f32.mrf.mxu0 }
  0xcb   :  { %v754_v4 = vpop.f32.mrf.mxu3  ;;  %v715_v8 = vadd.f32 %v714_v6, %v701_v5  ;;  %v741_v9 = vadd.f32 %v740_v3, %v727_v7  ;;  %v728_v10 = vpop.f32.mrf.mxu1 }
  0xcd   :  { %v729_v11 = vadd.f32 %v728_v10, %v715_v8  ;;  %v755_v13 = vadd.f32 %v754_v4, %v741_v9 }
  0xcf   :  { %v759_v17 = vmax.f32 %v755_v13, 0.0 }
  0xd2   :  { %v742_v12 = vpop.f32.mrf.mxu2 }
  0xd3   :  { %v743_v14 = vadd.f32 %v742_v12, %v729_v11  ;;  %v756_v15 = vpop.f32.mrf.mxu3 }
  0xd5   :  { %v757_v16 = vadd.f32 %v756_v15, %v743_v14 }
  0xd7   :  { %v760_v18 = vmax.f32 %v757_v16, 0.0 }
  0xd9   :  { %v761_v19 = vpack.c.bf16 %v760_v18, %v759_v17 }
  0xdb   :  { %838 = vmatmul.bf16.vlgmr.msra.gmra.mxu0 %v761_v19 }
 0x158   :  { %v839_v21 = vpop.f32.mrf.mxu0 }
 0x159   :  { %v840_v22 = vadd.f32 %v1215_v20, %v839_v21 }
 0x15b   :  { %844 = vst [vmem:[%s1385_s5] sm:$0xff] %v840_v22 }
 0x160   :  { %v841_v23 = vpop.f32.mrf.mxu0 }
 0x161   :  { %v842_v24 = vadd.f32 %v1215_v20, %v841_v23 }
 0x163   :  { %845 = vst [vmem:[%s1385_s5 + $0x8] sm:$0xff] %v842_v24 }
 0x164   :  { %850 = vsyncpa [#allocation3], 1 }

</bundles_post_ra>
